<compile_context>
chip_gen: v7x
topology: tpu7x:2x2x1
jax: 0.10.0
libtpu: 0.0.40
codegen_flags: <defaults>
</compile_context>

<pallas_src>
import functools

import jax
import jax.numpy as jnp
from jax.experimental import pallas as pl
from jax.experimental.pallas import tpu as pltpu


# ---------------------------------------------------------------------------
# Kernels
# ---------------------------------------------------------------------------
def _hard_kernel(thr_ref, u_ref, out_ref):
    """Hard (drawhard=True) path.

    thr_ref : (1, W)   per-lane threshold = sigmoid(-log_alpha), diag entries = 2.0
    u_ref   : (Br, W)  uniform(0,1) samples (g batch elements packed per row)
    out_ref : (Br, W)  0/1 masked adjacency values
    """
    out_ref[...] = (u_ref[...] > thr_ref[...]).astype(out_ref.dtype)


def _soft_kernel(la_ref, mask_ref, u_ref, out_ref, *, inv_tau):
    """Soft (drawhard=False) path.

    la_ref   : (1, W)   log_alpha tiled to the packed row layout
    mask_ref : (1, W)   (ones - eye) tiled to the packed row layout
    u_ref    : (Br, W)  uniform(0,1) samples
    out_ref  : (Br, W)
    """
    u = jnp.clip(u_ref[...], 1e-7, 1.0 - 1e-7)
    noise = jnp.log(u) - jnp.log1p(-u)
    y = jax.nn.sigmoid((la_ref[...] + noise) * inv_tau)
    out_ref[...] = (y * mask_ref[...]).astype(out_ref.dtype)


# ---------------------------------------------------------------------------
# Layout helpers
# ---------------------------------------------------------------------------
def _choose_group(bs, nn, max_width=2048):
    """Pack g batch elements per row so the row width g*nn is lane-dense."""
    divisors = [g for g in range(1, bs + 1) if bs % g == 0 and g * nn <= max_width]
    if not divisors:
        return 1
    aligned = [g for g in divisors if (g * nn) % 128 == 0]
    return max(aligned) if aligned else max(divisors)


def _choose_block_rows(num_rows, width, target_bytes=2 << 20):
    """Rows per grid step: ~target_bytes per block, multiple of 8 (or full extent)."""
    rows = max(1, target_bytes // (width * 4))
    if rows >= num_rows or num_rows < 8:
        return num_rows  # full extent is always a legal block dim
    return max(8, (rows // 8) * 8)


# ---------------------------------------------------------------------------
# Wrapper
# ---------------------------------------------------------------------------
def gumbel_adjacency_forward(log_alpha, uniform_noise, tau=1.0, drawhard=True):
    """log_alpha: (n, n) f32; uniform_noise: (bs, n, n) f32 in (0, 1)."""
    bs, n, n2 = uniform_noise.shape
    assert n == n2 and log_alpha.shape == (n, n)
    nn = n * n

    # Lane-dense packed layout: (bs, n, n) -> (R, W), W = g * nn.
    g = _choose_group(bs, nn)
    W = g * nn
    R = bs // g
    u2d = uniform_noise.reshape(R, W)

    Br = _choose_block_rows(R, W)
    grid = (pl.cdiv(R, Br),)

    row_spec = pl.BlockSpec((1, W), lambda r: (0, 0))     # grid-invariant, tiny
    blk_spec = pl.BlockSpec((Br, W), lambda r: (r, 0))

    cparams = pltpu.CompilerParams(
        dimension_semantics=("parallel",),   # megacore sharding on v7x
        vmem_limit_bytes=32 << 20,           # safe on v5e/v6e/v7x for 2 MiB blocks x2x2
    )

    if drawhard:
        # sigmoid((log_alpha + logit(u)) / tau) > 0.5  <=>  u > sigmoid(-log_alpha)
        thr = jax.nn.sigmoid(-log_alpha.astype(jnp.float32))
        thr = jnp.where(jnp.eye(n, dtype=bool), 2.0, thr)   # fold (ones - eye) mask in
        thr_row = jnp.tile(thr.reshape(1, nn), (1, g))
        out2d = pl.pallas_call(
            _hard_kernel,
            out_shape=jax.ShapeDtypeStruct((R, W), jnp.float32),
            grid_spec=pltpu.PrefetchScalarGridSpec(
                num_scalar_prefetch=0,
                grid=grid,
                in_specs=[row_spec, blk_spec],
                out_specs=blk_spec,
            ),
            compiler_params=cparams,
        )(thr_row, u2d)
    else:
        la_row = jnp.tile(log_alpha.astype(jnp.float32).reshape(1, nn), (1, g))
        mask_row = jnp.tile((1.0 - jnp.eye(n, dtype=jnp.float32)).reshape(1, nn), (1, g))
        kernel = functools.partial(_soft_kernel, inv_tau=float(1.0 / tau))
        out2d = pl.pallas_call(
            kernel,
            out_shape=jax.ShapeDtypeStruct((R, W), jnp.float32),
            grid_spec=pltpu.PrefetchScalarGridSpec(
                num_scalar_prefetch=0,
                grid=grid,
                in_specs=[row_spec, row_spec, blk_spec],
                out_specs=blk_spec,
            ),
            compiler_params=cparams,
        )(la_row, mask_row, u2d)

    return out2d.reshape(bs, n, n)


# ---------------------------------------------------------------------------
# Demo / correctness check
# ---------------------------------------------------------------------------
if __name__ == "__main__":
    num_vars = 8
    bs = 64
    start_adj_entry = 3.0  # torch.nn.init.constant_(log_alpha, start_adj_entry)
    tau = 1.0

    # Deterministic parameter init (reset_parameters with custom_init=False).
    log_alpha = jnp.full((num_vars, num_vars), start_adj_entry, dtype=jnp.float32)

    # Uniform(0,1) noise (torch.distributions.Uniform sample), deterministic.
    key = jax.random.PRNGKey(0)
    u = jax.random.uniform(
        key, (bs, num_vars, num_vars), dtype=jnp.float32,
        minval=1e-6, maxval=1.0 - 1e-6,
    )

    adj_hard = gumbel_adjacency_forward(log_alpha, u, tau=tau, drawhard=True)
    adj_hard = jax.block_until_ready(adj_hard)

    adj_soft = gumbel_adjacency_forward(log_alpha, u, tau=tau, drawhard=False)
    adj_soft = jax.block_until_ready(adj_soft)

    # Pure-JAX reference (mirrors the PyTorch forward).
    noise = jnp.log(u) - jnp.log(1.0 - u)
    y_soft = jax.nn.sigmoid((log_alpha[None] + noise) / tau)
    offdiag = (1.0 - jnp.eye(num_vars, dtype=jnp.float32))[None]
    ref_hard = (y_soft > 0.5).astype(jnp.float32) * offdiag
    ref_soft = y_soft * offdiag

    assert adj_hard.shape == (bs, num_vars, num_vars)
    assert jnp.array_equal(adj_hard, ref_hard), "hard-path mismatch vs reference"
    assert jnp.allclose(adj_soft, ref_soft, rtol=1e-4, atol=1e-6), "soft-path mismatch vs reference"

    print("KERNEL_OK")
</pallas_src>

<mosaic_0001>
module attributes {stable_mosaic.version = 11 : i64} {
  func.func @_hard_kernel(%arg0: i32, %arg1: memref<1x2048xf32, #tpu.memory_space<vmem>>, %arg2: memref<2x2048xf32, #tpu.memory_space<vmem>>, %arg3: memref<2x2048xf32, #tpu.memory_space<vmem>>) attributes {dimension_semantics = [#tpu.dimension_semantics<parallel>], iteration_bounds = array<i64: 1>, scalar_prefetch = 0 : i64, scratch_operands = 0 : i64, tpu.core_type = #tpu.core_type<tc>, window_params = [{pipeline_mode = #tpu.pipeline_mode<synchronous>, transform_indices = @transform_0, window_bounds = array<i64: 1, 2048>}, {transform_indices = @transform_1, window_bounds = array<i64: 2, 2048>}, {transform_indices = @transform_2, window_bounds = array<i64: 2, 2048>}]} {
    %c0 = arith.constant 0 : index
    %c0_0 = arith.constant 0 : index
    %0 = vector.load %arg2[%c0, %c0_0] : memref<2x2048xf32, #tpu.memory_space<vmem>>, vector<2x2048xf32>
    %c0_1 = arith.constant 0 : index
    %c0_2 = arith.constant 0 : index
    %1 = vector.load %arg1[%c0_1, %c0_2] : memref<1x2048xf32, #tpu.memory_space<vmem>>, vector<1x2048xf32>
    %2 = vector.broadcast %1 : vector<1x2048xf32> to vector<2x2048xf32>
    %3 = arith.cmpf ogt, %0, %2 : vector<2x2048xf32>
    %4 = arith.extui %3 : vector<2x2048xi1> to vector<2x2048xi32>
    %5 = arith.sitofp %4 : vector<2x2048xi32> to vector<2x2048xf32>
    %c0_3 = arith.constant 0 : index
    %c0_4 = arith.constant 0 : index
    %6 = vector.load %arg3[%c0_3, %c0_4] : memref<2x2048xf32, #tpu.memory_space<vmem>>, vector<2x2048xf32>
    tpu.vector_store %arg3[%c0_3, %c0_4], %5 {strides = array<i32>} : memref<2x2048xf32, #tpu.memory_space<vmem>>, vector<2x2048xf32>,
    return
  }
  func.func @transform_0(%arg0: i32) -> (i32, i32) {
    %c0_i32 = arith.constant 0 : i32
    %c0_i32_0 = arith.constant 0 : i32
    %c0_i32_1 = arith.constant 0 : i32
    return %c0_i32, %c0_i32_0 : i32, i32
  }
  func.func @transform_1(%arg0: i32) -> (i32, i32) {
    %c0_i32 = arith.constant 0 : i32
    %c0_i32_0 = arith.constant 0 : i32
    return %arg0, %c0_i32 : i32, i32
  }
  func.func @transform_2(%arg0: i32) -> (i32, i32) {
    %c0_i32 = arith.constant 0 : i32
    %c0_i32_0 = arith.constant 0 : i32
    return %arg0, %c0_i32 : i32, i32
  }
}

</mosaic_0001>

<bundles_post_ra>
// kernel: tpu_custom_call.1
= control target key start
LH: loop header
LB: loop body
LE: loop exit
PB: predicated region body
PF: predicated region fallthrough
CT: control target
= control target key end

     0   :  { %7 = vsyncpa [#allocation3], 0  ;;  %s349_s0 = inlined_call_operand.hbm [shape: f32[1,2048], index: 0, kind: input, shape index: {}]   ;;  %s350_s1 = inlined_call_operand.hbm [shape: f32[2,2048], index: 1, kind: input, shape index: {}]   ;;  %s351_s2 = inlined_call_operand.hbm [shape: f32[2,2048], index: 2, kind: output, shape index: {}]  }
   0x1   :  { %8 = vsyncpa [#allocation6], 0 }
   0x2   :  { %9 = vsyncpa [#allocation4], 0  ;;  %s293_s9 = smov [#allocation2]   ;;  %s294_s11 = smov [#allocation5]  }
   0x3   :  { %s16_s10 = sshll.u32 %s293_s9, 4  ;;  %s26_s12 = sshll.u32 %s294_s11, 4  ;;  %s17_s10 = int_to_ptr.vmem [resolvable:$true] %s16_s10  ;;  %s27_s12 = int_to_ptr.vmem [resolvable:$true] %s26_s12 }
   0x4   :  { %s221_s15 = scalar_lea.hbm %s349_s0, 256 }
   0x5   :  { %p222_p0 = scmp.ne.s32.totalorder %s349_s0, %s221_s15  ;;  %p225_p1 = scmp.lt.u32.totalorder %s221_s15, %s349_s0 }
   0x7   :  { %p227_p2 = pnand %p225_p1, %p222_p0 }
   0x9   :  { %230 = shalt.err (!%p227_p2)
}
   0xa   :  { %s231_s20 = scalar_lea.vmem %s17_s10, 256  ;;  %p236_p4 = scmp.lt.s32.totalorder %s17_s10, %s17_s10 }
   0xb   :  { %p232_p3 = scmp.ne.s32.totalorder %s17_s10, %s231_s20  ;;  %p237_p5 = scmp.lt.s32.totalorder %s231_s20, %s231_s20 }
   0xd   :  { %p238_p6 = por %p237_p5, %p236_p4 }
   0xf   :  { %p239_p7 = pnand %p238_p6, %p232_p3 }
  0x11   :  { %242 = shalt.err (!%p239_p7)
}
  0x12   :  { %19 = dma.hbm_to_vmem [thread:$0]  %s349_s0, 256, %s17_s10, [#allocation3]  }
  0x13   :  { %s243_s25 = scalar_lea.hbm %s350_s1, 512 }
  0x14   :  { %p244_p8 = scmp.ne.s32.totalorder %s350_s1, %s243_s25  ;;  %p247_p9 = scmp.lt.u32.totalorder %s243_s25, %s350_s1 }
  0x16   :  { %p249_p10 = pnand %p247_p9, %p244_p8 }
  0x18   :  { %252 = shalt.err (!%p249_p10)
}
  0x19   :  { %s253_s30 = scalar_lea.vmem %s27_s12, 512  ;;  %p258_p12 = scmp.lt.s32.totalorder %s27_s12, %s27_s12 }
  0x1a   :  { %p254_p11 = scmp.ne.s32.totalorder %s27_s12, %s253_s30  ;;  %p259_p13 = scmp.lt.s32.totalorder %s253_s30, %s253_s30 }
  0x1c   :  { %p260_p0 = por %p259_p13, %p258_p12 }
  0x1e   :  { %p261_p1 = pnand %p260_p0, %p254_p11 }
  0x20   :  { %264 = shalt.err (!%p261_p1)
}
  0x21   :  { %29 = dma.hbm_to_vmem [thread:$0]  %s350_s1, 512, %s27_s12, [#allocation6]  }
  0x22   :  { %287 = dma.done.wait [#allocation3], 256  }
  0x23   :  { %288 = vsyncadd [#allocation3], 4294967040 }
  0x24   :  { %289 = dma.done.wait [#allocation6], 512  }
  0x25   :  { %290 = vsyncadd [#allocation6], 4294966784  ;;  %v44_v0 = vlaneseq  ;;  %v295_v1 = vmov 1983009808   ;;  %v40_v13 = vld [vmem:[#allocation2] sm:$0xff]  ;;  %v41_v19 = vld [vmem:[#allocation2 + $0x8] sm:$0xff] }
  0x26   :  { %v111_v2 = vunpack.c.l.s4 %v295_v1  ;;  %v36_v36 = vld [vmem:[#allocation5] sm:$0xff]  ;;  %v37_v42 = vld [vmem:[#allocation5 + $0x8] sm:$0xff]  ;;  %v38_v49 = vld [vmem:[#allocation5 + $0x10] sm:$0xff]  ;;  %v296_v51 = vmov 0.0   ;;  %s297_s1 = smov [#allocation7]  }
  0x27   :  { %v45_v3 = vshrl.u32 %v44_v0, 7  ;;  %v39_v57 = vld [vmem:[#allocation5 + $0x18] sm:$0xff]  ;;  %s202_s4 = sshll.u32 %s297_s1, 4  ;;  %s203_s4 = int_to_ptr.vmem [resolvable:$true] %s202_s4 }
  0x28   :  { %v112_v4 = vunpack.c.0.s8 %v111_v2  ;;  %s265_s5 = scalar_lea.vmem %s203_s4, 512  ;;  %p270_p3 = scmp.lt.s32.totalorder %s203_s4, %s203_s4 }
  0x29   :  { %v46_v5 = vsub.s32 0, %v45_v3  ;;  %v50_v6 = vsub.s32 1, %v45_v3  ;;  %v54_v7 = vsub.s32 2, %v45_v3  ;;  %v58_v8 = vsub.s32 3, %v45_v3  ;;  %p266_p2 = scmp.ne.s32.totalorder %s203_s4, %s265_s5  ;;  %p271_p4 = scmp.lt.s32.totalorder %s265_s5, %s265_s5 }
  0x2a   :  { %v62_v9 = vsub.s32 4, %v45_v3  ;;  %v66_v10 = vsub.s32 5, %v45_v3  ;;  %v70_v11 = vsub.s32 6, %v45_v3  ;;  %v74_v12 = vsub.s32 7, %v45_v3 }
  0x2b   :  { %v115_v14 = vsub.s32 %v112_v4, %v45_v3  ;;  %v47_v15 = vrot.slane %v40_v13, %v46_v5  ;;  %v51_v16 = vrot.slane %v40_v13, %v50_v6  ;;  %v55_v17 = vrot.slane %v40_v13, %v54_v7  ;;  %p272_p5 = por %p271_p4, %p270_p3 }
  0x2c   :  { %v59_v18 = vrot.slane %v40_v13, %v58_v8  ;;  %v63_v20 = vrot.slane %v40_v13, %v62_v9  ;;  %v67_v21 = vrot.slane %v40_v13, %v66_v10  ;;  %v71_v22 = vrot.slane %v40_v13, %v70_v11 }
  0x2d   :  { %v75_v23 = vrot.slane %v40_v13, %v74_v12  ;;  %v108_v24 = vcombine.low %v47_v15, %v51_v16  ;;  %v79_v26 = vrot.slane %v41_v19, %v46_v5  ;;  %v83_v27 = vrot.slane %v41_v19, %v50_v6  ;;  %p273_p6 = pnand %p272_p5, %p266_p2 }
  0x2e   :  { %v109_v25 = vcombine.low %v55_v17, %v59_v18  ;;  %v125_v28 = vcombine.low %v63_v20, %v67_v21  ;;  %v87_v30 = vrot.slane %v41_v19, %v54_v7  ;;  %v91_v31 = vrot.slane %v41_v19, %v58_v8 }
  0x2f   :  { %v126_v29 = vcombine.low %v71_v22, %v75_v23  ;;  %v116_v32 = vrot.slane %v108_v24, %v115_v14  ;;  %v142_v34 = vcombine.low %v79_v26, %v83_v27  ;;  %v95_v35 = vrot.slane %v41_v19, %v62_v9 }
  0x30   :  { %v123_v33 = vrot.slane %v109_v25, %v115_v14  ;;  %v133_v37 = vrot.slane %v125_v28, %v115_v14  ;;  %v143_v39 = vcombine.low %v87_v30, %v91_v31  ;;  %v99_v40 = vrot.slane %v41_v19, %v66_v10 }
  0x31   :  { %v140_v38 = vrot.slane %v126_v29, %v115_v14  ;;  %v150_v43 = vrot.slane %v142_v34, %v115_v14  ;;  %v103_v44 = vrot.slane %v41_v19, %v70_v11  ;;  %v107_v45 = vrot.slane %v41_v19, %v74_v12 }
  0x32   :  { %v124_v41 = vcombine.low %v116_v32, %v123_v33  ;;  %v157_v47 = vrot.slane %v143_v39, %v115_v14  ;;  %v159_v48 = vcombine.low %v95_v35, %v99_v40 }
  0x33   :  { %v141_v46 = vcombine.low %v133_v37, %v140_v38  ;;  %v160_v50 = vcombine.low %v103_v44, %v107_v45 }
  0x34   :  { %vm180_vm0 = vcmp.gt.f32.partialorder %v36_v36, %v124_v41  ;;  %v158_v53 = vcombine.low %v150_v43, %v157_v47  ;;  %v167_v54 = vrot.slane %v159_v48, %v115_v14 }
  0x35   :  { %v212_v52 = vsel %vm180_vm0, 1.0, %v296_v51  ;;  %vm181_vm1 = vcmp.gt.f32.partialorder %v37_v42, %v141_v46  ;;  %v174_v56 = vrot.slane %v160_v50, %v115_v14 }
  0x36   :  { %192 = vst [vmem:[#allocation7] sm:$0xff] %v212_v52  ;;  %v213_v55 = vsel %vm181_vm1, 1.0, %v296_v51  ;;  %vm182_vm2 = vcmp.gt.f32.partialorder %v38_v49, %v158_v53 }
  0x37   :  { %193 = vst [vmem:[#allocation7 + $0x8] sm:$0xff] %v213_v55  ;;  %v214_v58 = vsel %vm182_vm2, 1.0, %v296_v51  ;;  %v175_v59 = vcombine.low %v167_v54, %v174_v56 }
  0x38   :  { %194 = vst [vmem:[#allocation7 + $0x10] sm:$0xff] %v214_v58 }
  0x39   :  { %vm183_vm3 = vcmp.gt.f32.partialorder %v39_v57, %v175_v59 }
  0x3a   :  { %v215_v60 = vsel %vm183_vm3, 1.0, %v296_v51 }
  0x3b   :  { %195 = vst [vmem:[#allocation7 + $0x18] sm:$0xff] %v215_v60 }
  0x3c   :  { %276 = shalt.err (!%p273_p6)
}
  0x3d   :  { %s277_s8 = scalar_lea.hbm %s351_s2, 512 }
  0x3e   :  { %p278_p7 = scmp.ne.s32.totalorder %s351_s2, %s277_s8  ;;  %p281_p8 = scmp.lt.u32.totalorder %s277_s8, %s351_s2 }
  0x40   :  { %p283_p9 = pnand %p281_p8, %p278_p7 }
  0x42   :  { %286 = shalt.err (!%p283_p9)
}
  0x43   :  { %205 = dma.vmem_to_hbm [thread:$0]  %s203_s4, 512, %s351_s2, [#allocation4]  }
  0x44   :  { %291 = dma.done.wait [#allocation4], 512  }
  0x45   :  { %292 = vsyncadd [#allocation4], 4294966784 }
  0x46   :  { %209 = vsyncpa [#allocation3], 1 }
  0x47   :  { %210 = vsyncpa [#allocation6], 1 }
  0x48   :  { %211 = vsyncpa [#allocation4], 1 }

</bundles_post_ra>
